<compile_context>
chip_gen: v6e
topology: v6e:2x2x1
jax: 0.10.0
libtpu: 0.0.40
codegen_flags: <defaults>
</compile_context>

<pallas_src>
import jax
import jax.numpy as jnp
from jax.experimental import pallas as pl
from jax.experimental.pallas import tpu as pltpu


def _normalize_kernel(mean_ref, inv_std_ref, x_ref, o_ref):
    # mean_ref, inv_std_ref : (ROW_TILE, 1) f32 VMEM blocks (per-row stats)
    # x_ref, o_ref          : (ROW_TILE, L) VMEM tiles
    x = x_ref[...].astype(jnp.float32)
    o_ref[...] = ((x - mean_ref[...]) * inv_std_ref[...]).astype(o_ref.dtype)


def _choose_lane_extent(hw, target_bytes):
    """Row length L (lane dim) of the (rows, L) working layout.

    Keep whole planes when a >=8-row block still fits comfortably; otherwise
    factor hw = S * L so the sublane/row axis carries the block volume."""
    if 8 * hw * 4 <= 2 * target_bytes:
        return hw                              # >= 8 whole planes fit a block
    for lane in (512, 256, 128):               # dense lanes, large S
        if hw % lane == 0:
            return lane
    for lane in range(4096, 127, -1):          # ragged spatial: any factor
        if hw % lane == 0:
            return lane
    # TODO(synk): prime-ish huge H*W falls back to giant single-plane rows;
    # would need in-kernel masked lane tiling to block it properly.
    return hw


def _choose_row_tile(rows, row_bytes, target_bytes):
    """Multiple-of-8 row count whose (ROW_TILE, L) f32 block hits the target;
    biased toward an even grid-step count so both v7x TensorCores stay fed."""
    if rows * row_bytes <= target_bytes or rows < 8:
        return rows
    t = (target_bytes // row_bytes) // 8 * 8
    t = max(8, min(t, (rows // 8) * 8))
    lower = max(8, t - 64)
    cand = t
    while cand >= lower:
        if (-(-rows // cand)) % 2 == 0:        # even number of grid steps
            return cand
        cand -= 8
    return t


def normalization_forward(img, mean, std, *, target_block_bytes=2 * 1024 * 1024):
    """img: (B, C, H, W); mean, std: (C,)."""
    B, C, H, W = img.shape
    HW = H * W
    R = B * C
    itemsize = jnp.dtype(img.dtype).itemsize

    L = _choose_lane_extent(HW, target_block_bytes)
    S = HW // L
    rows = R * S
    row_bytes = L * itemsize
    ROW_TILE = _choose_row_tile(rows, row_bytes, target_block_bytes)
    n_blocks = pl.cdiv(rows, ROW_TILE)

    # Free reshape (contiguous, L divides HW exactly): no pad, no extra pass.
    x = img.reshape(rows, L)

    # Per-row stats in f32 (tiny: 2 * rows * 4 bytes of extra HBM traffic).
    mean_rows = jnp.broadcast_to(
        mean.astype(jnp.float32).reshape(1, C, 1), (B, C, S)).reshape(rows, 1)
    inv_std_rows = jnp.broadcast_to(
        (1.0 / std.astype(jnp.float32)).reshape(1, C, 1), (B, C, S)).reshape(rows, 1)

    block_bytes = ROW_TILE * row_bytes
    # in+out double-buffered (~4x block) + stats; raise the scoped limit only
    # if the fallback path produced an oversized block, capped for v7x (64 MiB).
    vmem_limit = int(min(64 << 20, max(32 << 20, 6 * block_bytes)))

    out = pl.pallas_call(
        _normalize_kernel,
        out_shape=jax.ShapeDtypeStruct((rows, L), img.dtype),
        grid_spec=pltpu.PrefetchScalarGridSpec(
            num_scalar_prefetch=0,
            grid=(n_blocks,),
            in_specs=[
                pl.BlockSpec((ROW_TILE, 1), lambda r: (r, 0)),   # mean
                pl.BlockSpec((ROW_TILE, 1), lambda r: (r, 0)),   # 1/std
                pl.BlockSpec((ROW_TILE, L), lambda r: (r, 0)),   # img rows
            ],
            out_specs=pl.BlockSpec((ROW_TILE, L), lambda r: (r, 0)),
        ),
        compiler_params=pltpu.CompilerParams(
            dimension_semantics=("parallel",),
            vmem_limit_bytes=vmem_limit,
        ),
        cost_estimate=pl.CostEstimate(
            flops=2 * R * HW,
            transcendentals=0,
            bytes_accessed=2 * rows * L * itemsize + 2 * rows * 4,
        ),
    )(mean_rows, inv_std_rows, x)

    return out.reshape(B, C, H, W)


if __name__ == "__main__":
    # Classic ImageNet/VGG normalization stats (what this module is used with).
    mean = jnp.array([0.485, 0.456, 0.406], dtype=jnp.float32)
    std = jnp.array([0.229, 0.224, 0.225], dtype=jnp.float32)

    # Small deterministic input, NCHW.
    key = jax.random.PRNGKey(0)
    B, C, H, W = 2, 3, 16, 16
    img = jax.random.uniform(key, (B, C, H, W), dtype=jnp.float32)

    out = normalization_forward(img, mean, std)
    out = jax.block_until_ready(out)

    # Pure-JAX reference check (divide form, as in the PyTorch module).
    ref = (img - mean.reshape(1, C, 1, 1)) / std.reshape(1, C, 1, 1)
    assert out.shape == (B, C, H, W)
    assert jnp.allclose(out, ref, atol=1e-5, rtol=1e-6)

    print("KERNEL_OK")
</pallas_src>

<mosaic_0001>
module attributes {stable_mosaic.version = 11 : i64} {
  func.func @_normalize_kernel(%arg0: i32, %arg1: memref<6x1xf32, #tpu.memory_space<vmem>>, %arg2: memref<6x1xf32, #tpu.memory_space<vmem>>, %arg3: memref<6x256xf32, #tpu.memory_space<vmem>>, %arg4: memref<6x256xf32, #tpu.memory_space<vmem>>) attributes {dimension_semantics = [#tpu.dimension_semantics<parallel>], iteration_bounds = array<i64: 1>, scalar_prefetch = 0 : i64, scratch_operands = 0 : i64, tpu.core_type = #tpu.core_type<tc>, window_params = [{transform_indices = @transform_0, window_bounds = array<i64: 6, 1>}, {transform_indices = @transform_1, window_bounds = array<i64: 6, 1>}, {transform_indices = @transform_2, window_bounds = array<i64: 6, 256>}, {transform_indices = @transform_3, window_bounds = array<i64: 6, 256>}]} {
    %c0 = arith.constant 0 : index
    %c0_0 = arith.constant 0 : index
    %0 = vector.load %arg3[%c0, %c0_0] : memref<6x256xf32, #tpu.memory_space<vmem>>, vector<6x256xf32>
    %c0_1 = arith.constant 0 : index
    %c0_2 = arith.constant 0 : index
    %1 = vector.load %arg1[%c0_1, %c0_2] : memref<6x1xf32, #tpu.memory_space<vmem>>, vector<6x1xf32>
    %2 = vector.broadcast %1 : vector<6x1xf32> to vector<6x256xf32>
    %3 = arith.subf %0, %2 : vector<6x256xf32>
    %c0_3 = arith.constant 0 : index
    %c0_4 = arith.constant 0 : index
    %4 = vector.load %arg2[%c0_3, %c0_4] : memref<6x1xf32, #tpu.memory_space<vmem>>, vector<6x1xf32>
    %5 = vector.broadcast %4 : vector<6x1xf32> to vector<6x256xf32>
    %6 = arith.mulf %3, %5 : vector<6x256xf32>
    %c0_5 = arith.constant 0 : index
    %c0_6 = arith.constant 0 : index
    %7 = vector.load %arg4[%c0_5, %c0_6] : memref<6x256xf32, #tpu.memory_space<vmem>>, vector<6x256xf32>
    tpu.vector_store %arg4[%c0_5, %c0_6], %6 {strides = array<i32>} : memref<6x256xf32, #tpu.memory_space<vmem>>, vector<6x256xf32>,
    return
  }
  func.func @transform_0(%arg0: i32) -> (i32, i32) {
    %c0_i32 = arith.constant 0 : i32
    %c0_i32_0 = arith.constant 0 : i32
    return %arg0, %c0_i32 : i32, i32
  }
  func.func @transform_1(%arg0: i32) -> (i32, i32) {
    %c0_i32 = arith.constant 0 : i32
    %c0_i32_0 = arith.constant 0 : i32
    return %arg0, %c0_i32 : i32, i32
  }
  func.func @transform_2(%arg0: i32) -> (i32, i32) {
    %c0_i32 = arith.constant 0 : i32
    %c0_i32_0 = arith.constant 0 : i32
    return %arg0, %c0_i32 : i32, i32
  }
  func.func @transform_3(%arg0: i32) -> (i32, i32) {
    %c0_i32 = arith.constant 0 : i32
    %c0_i32_0 = arith.constant 0 : i32
    return %arg0, %c0_i32 : i32, i32
  }
}

</mosaic_0001>

<bundles_post_ra>
// kernel: tpu_custom_call.1
= control target key start
LH: loop header
LB: loop body
LE: loop exit
PB: predicated region body
PF: predicated region fallthrough
CT: control target
= control target key end

     0   :  { %v74_v1 = vmov 0   ;;  %s111_s0 = inlined_call_operand.vmem [shape: f32[6,1], index: 0, kind: input, shape index: {}]   ;;  %s112_s1 = inlined_call_operand.vmem [shape: f32[6,1], index: 1, kind: input, shape index: {}]   ;;  %s113_s2 = inlined_call_operand.vmem [shape: f32[6,256], index: 2, kind: input, shape index: {}]   ;;  %s114_s3 = inlined_call_operand.hbm [shape: f32[6,256], index: 3, kind: output, shape index: {}]  }
   0x1   :  { %v17_v0 = vld [vmem:[%s111_s0] sm:$0x3f]  ;;  %51 = vset.pattern.permute.xlu0 %v74_v1 }
   0x2   :  { %8 = vsyncpa [#allocation3], 0  ;;  %20 = vperm.xlu0 %51, %v17_v0   ;;  %v25_v2 = vld [vmem:[%s112_s1] sm:$0x3f]  ;;  %v16_v5 = vld [vmem:[%s113_s2 + $0x8] sm:$0x3f] }
   0x3   :  { %v15_v4 = vld [vmem:[%s113_s2] sm:$0x3f]  ;;  %s75_s20 = smov [#allocation2]  }
   0x4   :  { %s41_s0 = sshll.u32 %s75_s20, 4  ;;  %s42_s0 = int_to_ptr.vmem [resolvable:$true] %s41_s0 }
   0x5   :  { %s52_s1 = scalar_lea.vmem %s42_s0, 256  ;;  %p57_p1 = scmp.lt.s32.totalorder %s42_s0, %s42_s0 }
   0x6   :  { %28 = vperm.xlu0 %51, %v25_v2   ;;  %p53_p0 = scmp.ne.s32.totalorder %s42_s0, %s52_s1  ;;  %p58_p2 = scmp.lt.s32.totalorder %s52_s1, %s52_s1 }
   0x8   :  { %p59_p3 = por %p58_p2, %p57_p1 }
   0xa   :  { %p60_p4 = pnand %p59_p3, %p53_p0 }
  0x7d   :  { %v21_v3 = vpop.permute.xlu0 %20 }
  0x7e   :  { %v23_v6 = vsub.f32 %v15_v4, %v21_v3  ;;  %v24_v7 = vsub.f32 %v16_v5, %v21_v3 }
  0x81   :  { %v29_v8 = vpop.permute.xlu0 %28 }
  0x82   :  { %v31_v9 = vmul.f32 %v29_v8, %v23_v6  ;;  %v32_v10 = vmul.f32 %v29_v8, %v24_v7 }
  0x84   :  { %33 = vst [vmem:[#allocation2] sm:$0x3f] %v31_v9  ;;  %34 = vst [vmem:[#allocation2 + $0x8] sm:$0x3f] %v32_v10 }
  0x85   :  { %63 = shalt.err (!%p60_p4)
}
  0x86   :  { %44 = dma.vmem_to_hbm [thread:$0]  %s42_s0, 256, %s114_s3, [#allocation3]  }
  0x87   :  { %72 = dma.done.wait [#allocation3], 256  }
  0x88   :  { %73 = vsyncadd [#allocation3], 4294967040 }
  0x89   :  { %48 = vsyncpa [#allocation3], 1 }

</bundles_post_ra>
